<compile_context>
chip_gen: v6e
topology: v6e:2x2x1
jax: 0.10.0
libtpu: 0.0.40
codegen_flags: <defaults>
</compile_context>

<pallas_src>
import math
import functools

import jax
import jax.numpy as jnp
from jax.experimental import pallas as pl
from jax.experimental.pallas import tpu as pltpu

# ----------------------------- configuration --------------------------------
SEQ = 8          # sequence length S
BATCH = 2        # batch size B
D_MODEL = 32     # d_model D
NHEAD = 4        # number of attention heads
DIM_FF = 64      # feed-forward hidden dim
NUM_LAYERS = 2   # number of (shared-weight) encoder layers
LN_EPS = 1e-5


def _layernorm(x, w, b):
    # x: (R, D) f32; w, b: (1, D) f32
    mu = jnp.mean(x, axis=-1, keepdims=True)
    xc = x - mu
    var = jnp.mean(xc * xc, axis=-1, keepdims=True)
    inv = jax.lax.rsqrt(var + LN_EPS)
    return xc * inv * w + b


def _encoder_stack_kernel(x_ref,
                          wq_ref, bq_ref, wk_ref, bk_ref, wv_ref, bv_ref,
                          wo_ref, bo_ref, ln1w_ref, ln1b_ref,
                          w1_ref, b1_ref, w2_ref, b2_ref,
                          ln2w_ref, ln2b_ref,
                          out_ref, *, nhead, num_layers):
    # x_ref / out_ref: (S, D) block for one batch element (leading B squeezed).
    S, D = x_ref.shape
    hd = D // nhead

    x0 = x_ref[...].astype(jnp.float32)

    def layer(_, x):
        # ---- multi-head self attention (all heads in one batched contraction)
        x_bf = x.astype(jnp.bfloat16)
        # Weight refs are bf16 (cast host-side); biases / LN params are f32.
        q = jnp.dot(x_bf, wq_ref[...], preferred_element_type=jnp.float32) + bq_ref[...]
        k = jnp.dot(x_bf, wk_ref[...], preferred_element_type=jnp.float32) + bk_ref[...]
        v = jnp.dot(x_bf, wv_ref[...], preferred_element_type=jnp.float32) + bv_ref[...]

        qh = q.astype(jnp.bfloat16).reshape(S, nhead, hd)
        kh = k.astype(jnp.bfloat16).reshape(S, nhead, hd)
        vh = v.astype(jnp.bfloat16).reshape(S, nhead, hd)

        s = jnp.einsum('qhd,khd->hqk', qh, kh,
                       preferred_element_type=jnp.float32)          # (H, S, S) f32
        s = s - jnp.max(s, axis=-1, keepdims=True)
        p = jnp.exp(s)
        p = p / jnp.sum(p, axis=-1, keepdims=True)                  # exact softmax
        oh = jnp.einsum('hqk,khd->qhd', p.astype(jnp.bfloat16), vh,
                        preferred_element_type=jnp.float32)         # (S, H, hd) f32

        attn = jnp.dot(oh.reshape(S, D).astype(jnp.bfloat16), wo_ref[...],
                       preferred_element_type=jnp.float32) + bo_ref[...]

        # ---- residual + layernorm 1 (f32) ---------------------------------
        x1 = _layernorm(x + attn, ln1w_ref[...], ln1b_ref[...])

        # ---- feed-forward ---------------------------------------------------
        h1 = jnp.dot(x1.astype(jnp.bfloat16), w1_ref[...],
                     preferred_element_type=jnp.float32) + b1_ref[...]
        h1 = jnp.maximum(h1, 0.0)                                   # relu (f32)
        h2 = jnp.dot(h1.astype(jnp.bfloat16), w2_ref[...],
                     preferred_element_type=jnp.float32) + b2_ref[...]

        # ---- residual + layernorm 2 (f32) ---------------------------------
        return _layernorm(x1 + h2, ln2w_ref[...], ln2b_ref[...])

    # Shared weights across layers -> simple carried loop (bounds live ranges).
    x = jax.lax.fori_loop(0, num_layers, layer, x0)
    out_ref[...] = x.astype(out_ref.dtype)


_WEIGHT_ORDER = ("wq", "bq", "wk", "bk", "wv", "bv", "wo", "bo",
                 "ln1w", "ln1b", "w1", "b1", "w2", "b2", "ln2w", "ln2b")


def transformer_encoder(src_sbd, kernel_params, num_layers, nhead):
    """src_sbd: (S, B, D) — PyTorch nn.TransformerEncoder default layout."""
    S, B, D = src_sbd.shape
    x = jnp.transpose(src_sbd, (1, 0, 2))            # -> (B, S, D) kernel layout
    weights = tuple(kernel_params[k] for k in _WEIGHT_ORDER)

    kernel = functools.partial(_encoder_stack_kernel,
                               nhead=nhead, num_layers=num_layers)

    # Batch-parallel grid: one sequence per grid step (v7x: one per TensorCore).
    act_spec = pl.BlockSpec((None, S, D), lambda b: (b, 0, 0))
    wgt_specs = [pl.BlockSpec(w.shape, lambda b: (0, 0)) for w in weights]

    out = pl.pallas_call(
        kernel,
        out_shape=jax.ShapeDtypeStruct((B, S, D), src_sbd.dtype),
        grid=(B,),
        in_specs=[act_spec] + wgt_specs,
        out_specs=act_spec,
        compiler_params=pltpu.CompilerParams(
            dimension_semantics=("parallel",)),
    )(x, *weights)

    return jnp.transpose(out, (1, 0, 2))              # back to (S, B, D)


def make_params(key, d_model, nhead, dim_ff):
    """Parameters in PyTorch nn.TransformerEncoderLayer shapes (f32)."""
    ks = jax.random.split(key, 6)
    s = 0.05
    return {
        "in_proj_weight":  s * jax.random.normal(ks[0], (3 * d_model, d_model), jnp.float32),
        "in_proj_bias":    s * jax.random.normal(ks[1], (3 * d_model,), jnp.float32),
        "out_proj_weight": s * jax.random.normal(ks[2], (d_model, d_model), jnp.float32),
        "out_proj_bias":   s * jax.random.normal(ks[3], (d_model,), jnp.float32),
        "ln1_weight": jnp.ones((d_model,), jnp.float32),
        "ln1_bias":   jnp.zeros((d_model,), jnp.float32),
        "ln2_weight": jnp.ones((d_model,), jnp.float32),
        "ln2_bias":   jnp.zeros((d_model,), jnp.float32),
        "linear1_weight": s * jax.random.normal(ks[4], (dim_ff, d_model), jnp.float32),
        "linear1_bias":   jnp.zeros((dim_ff,), jnp.float32),
        "linear2_weight": s * jax.random.normal(ks[5], (d_model, dim_ff), jnp.float32),
        "linear2_bias":   jnp.zeros((d_model,), jnp.float32),
    }


def prepare_kernel_params(p, nhead):
    """Host-side one-time prep: transpose to x@W layout, split q/k/v, fold the
    1/sqrt(head_dim) scale into Wq/bq, cast matmul weights to bf16, keep
    biases / LN params as f32 (1, D) rows."""
    d_model = p["out_proj_weight"].shape[0]
    hd = d_model // nhead
    scale = 1.0 / math.sqrt(hd)
    wq, wk, wv = jnp.split(p["in_proj_weight"], 3, axis=0)   # each (D, D)
    bq, bk, bv = jnp.split(p["in_proj_bias"], 3)

    def row(b):
        return b.reshape(1, -1).astype(jnp.float32)

    def mat(w):                                # MXU operand: x @ W layout, bf16
        return w.T.astype(jnp.bfloat16)

    return {
        "wq": mat(wq * scale), "bq": row(bq * scale),
        "wk": mat(wk),         "bk": row(bk),
        "wv": mat(wv),         "bv": row(bv),
        "wo": mat(p["out_proj_weight"]), "bo": row(p["out_proj_bias"]),
        "ln1w": row(p["ln1_weight"]), "ln1b": row(p["ln1_bias"]),
        "w1": mat(p["linear1_weight"]), "b1": row(p["linear1_bias"]),
        "w2": mat(p["linear2_weight"]), "b2": row(p["linear2_bias"]),
        "ln2w": row(p["ln2_weight"]), "ln2b": row(p["ln2_bias"]),
    }


if __name__ == "__main__":
    key = jax.random.PRNGKey(0)
    k_x, k_p = jax.random.split(key)

    # src: (S, B, D) as in PyTorch's default (batch_first=False) layout.
    src = jax.random.normal(k_x, (SEQ, BATCH, D_MODEL), jnp.float32)
    params = make_params(k_p, D_MODEL, NHEAD, DIM_FF)
    kparams = prepare_kernel_params(params, NHEAD)

    out = transformer_encoder(src, kparams, NUM_LAYERS, NHEAD)
    out = jax.block_until_ready(out)
    assert out.shape == (SEQ, BATCH, D_MODEL)
    assert jnp.all(jnp.isfinite(out))
    print("KERNEL_OK")
</pallas_src>

<mosaic_0001>
module attributes {stable_mosaic.version = 11 : i64} {
  func.func @_encoder_stack_kernel(%arg0: i32, %arg1: memref<1x8x32xf32, #tpu.memory_space<vmem>>, %arg2: memref<32x32xbf16, #tpu.memory_space<vmem>>, %arg3: memref<1x32xf32, #tpu.memory_space<vmem>>, %arg4: memref<32x32xbf16, #tpu.memory_space<vmem>>, %arg5: memref<1x32xf32, #tpu.memory_space<vmem>>, %arg6: memref<32x32xbf16, #tpu.memory_space<vmem>>, %arg7: memref<1x32xf32, #tpu.memory_space<vmem>>, %arg8: memref<32x32xbf16, #tpu.memory_space<vmem>>, %arg9: memref<1x32xf32, #tpu.memory_space<vmem>>, %arg10: memref<1x32xf32, #tpu.memory_space<vmem>>, %arg11: memref<1x32xf32, #tpu.memory_space<vmem>>, %arg12: memref<32x64xbf16, #tpu.memory_space<vmem>>, %arg13: memref<1x64xf32, #tpu.memory_space<vmem>>, %arg14: memref<64x32xbf16, #tpu.memory_space<vmem>>, %arg15: memref<1x32xf32, #tpu.memory_space<vmem>>, %arg16: memref<1x32xf32, #tpu.memory_space<vmem>>, %arg17: memref<1x32xf32, #tpu.memory_space<vmem>>, %arg18: memref<1x8x32xf32, #tpu.memory_space<vmem>>) attributes {dimension_semantics = [#tpu.dimension_semantics<parallel>], iteration_bounds = array<i64: 2>, scalar_prefetch = 0 : i64, scratch_operands = 0 : i64, tpu.core_type = #tpu.core_type<tc>, window_params = [{transform_indices = @transform_0, window_bounds = array<i64: 1, 8, 32>}, {pipeline_mode = #tpu.pipeline_mode<synchronous>, transform_indices = @transform_1, window_bounds = array<i64: 32, 32>}, {pipeline_mode = #tpu.pipeline_mode<synchronous>, transform_indices = @transform_2, window_bounds = array<i64: 1, 32>}, {pipeline_mode = #tpu.pipeline_mode<synchronous>, transform_indices = @transform_3, window_bounds = array<i64: 32, 32>}, {pipeline_mode = #tpu.pipeline_mode<synchronous>, transform_indices = @transform_4, window_bounds = array<i64: 1, 32>}, {pipeline_mode = #tpu.pipeline_mode<synchronous>, transform_indices = @transform_5, window_bounds = array<i64: 32, 32>}, {pipeline_mode = #tpu.pipeline_mode<synchronous>, transform_indices = @transform_6, window_bounds = array<i64: 1, 32>}, {pipeline_mode = #tpu.pipeline_mode<synchronous>, transform_indices = @transform_7, window_bounds = array<i64: 32, 32>}, {pipeline_mode = #tpu.pipeline_mode<synchronous>, transform_indices = @transform_8, window_bounds = array<i64: 1, 32>}, {pipeline_mode = #tpu.pipeline_mode<synchronous>, transform_indices = @transform_9, window_bounds = array<i64: 1, 32>}, {pipeline_mode = #tpu.pipeline_mode<synchronous>, transform_indices = @transform_10, window_bounds = array<i64: 1, 32>}, {pipeline_mode = #tpu.pipeline_mode<synchronous>, transform_indices = @transform_11, window_bounds = array<i64: 32, 64>}, {pipeline_mode = #tpu.pipeline_mode<synchronous>, transform_indices = @transform_12, window_bounds = array<i64: 1, 64>}, {pipeline_mode = #tpu.pipeline_mode<synchronous>, transform_indices = @transform_13, window_bounds = array<i64: 64, 32>}, {pipeline_mode = #tpu.pipeline_mode<synchronous>, transform_indices = @transform_14, window_bounds = array<i64: 1, 32>}, {pipeline_mode = #tpu.pipeline_mode<synchronous>, transform_indices = @transform_15, window_bounds = array<i64: 1, 32>}, {pipeline_mode = #tpu.pipeline_mode<synchronous>, transform_indices = @transform_16, window_bounds = array<i64: 1, 32>}, {transform_indices = @transform_17, window_bounds = array<i64: 1, 8, 32>}]} {
    %c0 = arith.constant 0 : index
    %c0_0 = arith.constant 0 : index
    %c0_1 = arith.constant 0 : index
    %0 = vector.load %arg1[%c0, %c0_0, %c0_1] : memref<1x8x32xf32, #tpu.memory_space<vmem>>, vector<1x8x32xf32>
    %1 = vector.shape_cast %0 : vector<1x8x32xf32> to vector<8x32xf32>
    %c0_i32 = arith.constant 0 : i32
    %c2_i32 = arith.constant 2 : i32
    %2 = arith.addi %c0_i32, %c2_i32 : i32
    %c1_i32 = arith.constant 1 : i32
    %3 = scf.for %arg19 = %c0_i32 to %2 step %c1_i32 iter_args(%arg20 = %1) -> (vector<8x32xf32>)  : i32 {
      %7 = arith.truncf %arg20 : vector<8x32xf32> to vector<8x32xbf16>
      %c0_5 = arith.constant 0 : index
      %c0_6 = arith.constant 0 : index
      %8 = vector.load %arg2[%c0_5, %c0_6] : memref<32x32xbf16, #tpu.memory_space<vmem>>, vector<32x32xbf16>
      %cst = arith.constant dense<0.000000e+00> : vector<8x32xf32>
      %9 = tpu.matmul %7, %8, %cst {dimension_numbers = #tpu.dot_dimension_numbers<[1], [0], [0], [1], [0, 0, 1, 1], [], []>} : vector<8x32xbf16>, vector<32x32xbf16>, vector<8x32xf32> -> vector<8x32xf32>
      %c0_7 = arith.constant 0 : index
      %c0_8 = arith.constant 0 : index
      %10 = vector.load %arg3[%c0_7, %c0_8] : memref<1x32xf32, #tpu.memory_space<vmem>>, vector<1x32xf32>
      %11 = vector.broadcast %10 : vector<1x32xf32> to vector<8x32xf32>
      %12 = arith.addf %9, %11 : vector<8x32xf32>
      %c0_9 = arith.constant 0 : index
      %c0_10 = arith.constant 0 : index
      %13 = vector.load %arg4[%c0_9, %c0_10] : memref<32x32xbf16, #tpu.memory_space<vmem>>, vector<32x32xbf16>
      %cst_11 = arith.constant dense<0.000000e+00> : vector<8x32xf32>
      %14 = tpu.matmul %7, %13, %cst_11 {dimension_numbers = #tpu.dot_dimension_numbers<[1], [0], [0], [1], [0, 0, 1, 1], [], []>} : vector<8x32xbf16>, vector<32x32xbf16>, vector<8x32xf32> -> vector<8x32xf32>
      %c0_12 = arith.constant 0 : index
      %c0_13 = arith.constant 0 : index
      %15 = vector.load %arg5[%c0_12, %c0_13] : memref<1x32xf32, #tpu.memory_space<vmem>>, vector<1x32xf32>
      %16 = vector.broadcast %15 : vector<1x32xf32> to vector<8x32xf32>
      %17 = arith.addf %14, %16 : vector<8x32xf32>
      %c0_14 = arith.constant 0 : index
      %c0_15 = arith.constant 0 : index
      %18 = vector.load %arg6[%c0_14, %c0_15] : memref<32x32xbf16, #tpu.memory_space<vmem>>, vector<32x32xbf16>
      %cst_16 = arith.constant dense<0.000000e+00> : vector<8x32xf32>
      %19 = tpu.matmul %7, %18, %cst_16 {dimension_numbers = #tpu.dot_dimension_numbers<[1], [0], [0], [1], [0, 0, 1, 1], [], []>} : vector<8x32xbf16>, vector<32x32xbf16>, vector<8x32xf32> -> vector<8x32xf32>
      %c0_17 = arith.constant 0 : index
      %c0_18 = arith.constant 0 : index
      %20 = vector.load %arg7[%c0_17, %c0_18] : memref<1x32xf32, #tpu.memory_space<vmem>>, vector<1x32xf32>
      %21 = vector.broadcast %20 : vector<1x32xf32> to vector<8x32xf32>
      %22 = arith.addf %19, %21 : vector<8x32xf32>
      %23 = arith.truncf %12 : vector<8x32xf32> to vector<8x32xbf16>
      %24 = vector.shape_cast %23 : vector<8x32xbf16> to vector<8x4x8xbf16>
      %25 = arith.truncf %17 : vector<8x32xf32> to vector<8x32xbf16>
      %26 = vector.shape_cast %25 : vector<8x32xbf16> to vector<8x4x8xbf16>
      %27 = arith.truncf %22 : vector<8x32xf32> to vector<8x32xbf16>
      %28 = vector.shape_cast %27 : vector<8x32xbf16> to vector<8x4x8xbf16>
      "tpu.trace_start"() <{level = 10 : i32, message = "qhd,khd->hqk"}> : () -> ()
      %cst_19 = arith.constant dense<0.000000e+00> : vector<4x8x8xf32>
      %29 = tpu.matmul %24, %26, %cst_19 {dimension_numbers = #tpu.dot_dimension_numbers<[2], [2], [0], [0], [0, 1, 0, 0, 1, 0], [1], [1]>} : vector<8x4x8xbf16>, vector<8x4x8xbf16>, vector<4x8x8xf32> -> vector<4x8x8xf32>
      "tpu.trace_stop"() : () -> ()
      %cst_20 = arith.constant dense<0xFF800000> : vector<4x8xf32>
      %30 = vector.multi_reduction <maximumf>, %29, %cst_20 [2] : vector<4x8x8xf32> to vector<4x8xf32>
      %31 = vector.shape_cast %30 : vector<4x8xf32> to vector<4x8x1xf32>
      %32 = vector.broadcast %31 : vector<4x8x1xf32> to vector<4x8x8xf32>
      %33 = arith.subf %29, %32 : vector<4x8x8xf32>
      %34 = math.exp %33 : vector<4x8x8xf32>
      %cst_21 = arith.constant dense<0.000000e+00> : vector<4x8xf32>
      %35 = vector.multi_reduction <add>, %34, %cst_21 [2] : vector<4x8x8xf32> to vector<4x8xf32>
      %36 = vector.shape_cast %35 : vector<4x8xf32> to vector<4x8x1xf32>
      %37 = vector.broadcast %36 : vector<4x8x1xf32> to vector<4x8x8xf32>
      %38 = arith.divf %34, %37 : vector<4x8x8xf32>
      %39 = arith.truncf %38 : vector<4x8x8xf32> to vector<4x8x8xbf16>
      "tpu.trace_start"() <{level = 10 : i32, message = "hqk,khd->qhd"}> : () -> ()
      %cst_22 = arith.constant dense<0.000000e+00> : vector<4x8x8xf32>
      %40 = tpu.matmul %28, %39, %cst_22 {dimension_numbers = #tpu.dot_dimension_numbers<[0], [2], [2], [1], [0, 1, 0, 2, 1, 1], [1], [0]>} : vector<8x4x8xbf16>, vector<4x8x8xbf16>, vector<4x8x8xf32> -> vector<4x8x8xf32>
      %41 = tpu.transpose %40, [2, 0, 1] : vector<4x8x8xf32> -> vector<8x4x8xf32>
      "tpu.trace_stop"() : () -> ()
      %42 = vector.shape_cast %41 : vector<8x4x8xf32> to vector<8x32xf32>
      %43 = arith.truncf %42 : vector<8x32xf32> to vector<8x32xbf16>
      %c0_23 = arith.constant 0 : index
      %c0_24 = arith.constant 0 : index
      %44 = vector.load %arg8[%c0_23, %c0_24] : memref<32x32xbf16, #tpu.memory_space<vmem>>, vector<32x32xbf16>
      %cst_25 = arith.constant dense<0.000000e+00> : vector<8x32xf32>
      %45 = tpu.matmul %43, %44, %cst_25 {dimension_numbers = #tpu.dot_dimension_numbers<[1], [0], [0], [1], [0, 0, 1, 1], [], []>} : vector<8x32xbf16>, vector<32x32xbf16>, vector<8x32xf32> -> vector<8x32xf32>
      %c0_26 = arith.constant 0 : index
      %c0_27 = arith.constant 0 : index
      %46 = vector.load %arg9[%c0_26, %c0_27] : memref<1x32xf32, #tpu.memory_space<vmem>>, vector<1x32xf32>
      %47 = vector.broadcast %46 : vector<1x32xf32> to vector<8x32xf32>
      %48 = arith.addf %45, %47 : vector<8x32xf32>
      %49 = arith.addf %arg20, %48 : vector<8x32xf32>
      %c0_28 = arith.constant 0 : index
      %c0_29 = arith.constant 0 : index
      %50 = vector.load %arg10[%c0_28, %c0_29] : memref<1x32xf32, #tpu.memory_space<vmem>>, vector<1x32xf32>
      %c0_30 = arith.constant 0 : index
      %c0_31 = arith.constant 0 : index
      %51 = vector.load %arg11[%c0_30, %c0_31] : memref<1x32xf32, #tpu.memory_space<vmem>>, vector<1x32xf32>
      %cst_32 = arith.constant dense<0.000000e+00> : vector<8xf32>
      %52 = vector.multi_reduction <add>, %49, %cst_32 [1] : vector<8x32xf32> to vector<8xf32>
      %53 = vector.shape_cast %52 : vector<8xf32> to vector<8x1xf32>
      %cst_33 = arith.constant 3.200000e+01 : f32
      %54 = vector.broadcast %cst_33 : f32 to vector<8x1xf32>
      %55 = arith.divf %53, %54 : vector<8x1xf32>
      %56 = vector.broadcast %55 : vector<8x1xf32> to vector<8x32xf32>
      %57 = arith.subf %49, %56 : vector<8x32xf32>
      %58 = arith.mulf %57, %57 : vector<8x32xf32>
      %cst_34 = arith.constant dense<0.000000e+00> : vector<8xf32>
      %59 = vector.multi_reduction <add>, %58, %cst_34 [1] : vector<8x32xf32> to vector<8xf32>
      %60 = vector.shape_cast %59 : vector<8xf32> to vector<8x1xf32>
      %cst_35 = arith.constant 3.200000e+01 : f32
      %61 = vector.broadcast %cst_35 : f32 to vector<8x1xf32>
      %62 = arith.divf %60, %61 : vector<8x1xf32>
      %cst_36 = arith.constant 9.99999974E-6 : f32
      %63 = vector.broadcast %cst_36 : f32 to vector<8x1xf32>
      %64 = arith.addf %62, %63 : vector<8x1xf32>
      %65 = math.rsqrt %64 : vector<8x1xf32>
      %66 = vector.broadcast %65 : vector<8x1xf32> to vector<8x32xf32>
      %67 = arith.mulf %57, %66 : vector<8x32xf32>
      %68 = vector.broadcast %50 : vector<1x32xf32> to vector<8x32xf32>
      %69 = arith.mulf %67, %68 : vector<8x32xf32>
      %70 = vector.broadcast %51 : vector<1x32xf32> to vector<8x32xf32>
      %71 = arith.addf %69, %70 : vector<8x32xf32>
      %72 = arith.truncf %71 : vector<8x32xf32> to vector<8x32xbf16>
      %c0_37 = arith.constant 0 : index
      %c0_38 = arith.constant 0 : index
      %73 = vector.load %arg12[%c0_37, %c0_38] : memref<32x64xbf16, #tpu.memory_space<vmem>>, vector<32x64xbf16>
      %cst_39 = arith.constant dense<0.000000e+00> : vector<8x64xf32>
      %74 = tpu.matmul %72, %73, %cst_39 {dimension_numbers = #tpu.dot_dimension_numbers<[1], [0], [0], [1], [0, 0, 1, 1], [], []>} : vector<8x32xbf16>, vector<32x64xbf16>, vector<8x64xf32> -> vector<8x64xf32>
      %c0_40 = arith.constant 0 : index
      %c0_41 = arith.constant 0 : index
      %75 = vector.load %arg13[%c0_40, %c0_41] : memref<1x64xf32, #tpu.memory_space<vmem>>, vector<1x64xf32>
      %76 = vector.broadcast %75 : vector<1x64xf32> to vector<8x64xf32>
      %77 = arith.addf %74, %76 : vector<8x64xf32>
      %cst_42 = arith.constant 0.000000e+00 : f32
      %78 = vector.broadcast %cst_42 : f32 to vector<8x64xf32>
      %79 = arith.maximumf %77, %78 : vector<8x64xf32>
      %80 = arith.truncf %79 : vector<8x64xf32> to vector<8x64xbf16>
      %c0_43 = arith.constant 0 : index
      %c0_44 = arith.constant 0 : index
      %81 = vector.load %arg14[%c0_43, %c0_44] : memref<64x32xbf16, #tpu.memory_space<vmem>>, vector<64x32xbf16>
      %cst_45 = arith.constant dense<0.000000e+00> : vector<8x32xf32>
      %82 = tpu.matmul %80, %81, %cst_45 {dimension_numbers = #tpu.dot_dimension_numbers<[1], [0], [0], [1], [0, 0, 1, 1], [], []>} : vector<8x64xbf16>, vector<64x32xbf16>, vector<8x32xf32> -> vector<8x32xf32>
      %c0_46 = arith.constant 0 : index
      %c0_47 = arith.constant 0 : index
      %83 = vector.load %arg15[%c0_46, %c0_47] : memref<1x32xf32, #tpu.memory_space<vmem>>, vector<1x32xf32>
      %84 = vector.broadcast %83 : vector<1x32xf32> to vector<8x32xf32>
      %85 = arith.addf %82, %84 : vector<8x32xf32>
      %86 = arith.addf %71, %85 : vector<8x32xf32>
      %c0_48 = arith.constant 0 : index
      %c0_49 = arith.constant 0 : index
      %87 = vector.load %arg16[%c0_48, %c0_49] : memref<1x32xf32, #tpu.memory_space<vmem>>, vector<1x32xf32>
      %c0_50 = arith.constant 0 : index
      %c0_51 = arith.constant 0 : index
      %88 = vector.load %arg17[%c0_50, %c0_51] : memref<1x32xf32, #tpu.memory_space<vmem>>, vector<1x32xf32>
      %cst_52 = arith.constant dense<0.000000e+00> : vector<8xf32>
      %89 = vector.multi_reduction <add>, %86, %cst_52 [1] : vector<8x32xf32> to vector<8xf32>
      %90 = vector.shape_cast %89 : vector<8xf32> to vector<8x1xf32>
      %cst_53 = arith.constant 3.200000e+01 : f32
      %91 = vector.broadcast %cst_53 : f32 to vector<8x1xf32>
      %92 = arith.divf %90, %91 : vector<8x1xf32>
      %93 = vector.broadcast %92 : vector<8x1xf32> to vector<8x32xf32>
      %94 = arith.subf %86, %93 : vector<8x32xf32>
      %95 = arith.mulf %94, %94 : vector<8x32xf32>
      %cst_54 = arith.constant dense<0.000000e+00> : vector<8xf32>
      %96 = vector.multi_reduction <add>, %95, %cst_54 [1] : vector<8x32xf32> to vector<8xf32>
      %97 = vector.shape_cast %96 : vector<8xf32> to vector<8x1xf32>
      %cst_55 = arith.constant 3.200000e+01 : f32
      %98 = vector.broadcast %cst_55 : f32 to vector<8x1xf32>
      %99 = arith.divf %97, %98 : vector<8x1xf32>
      %cst_56 = arith.constant 9.99999974E-6 : f32
      %100 = vector.broadcast %cst_56 : f32 to vector<8x1xf32>
      %101 = arith.addf %99, %100 : vector<8x1xf32>
      %102 = math.rsqrt %101 : vector<8x1xf32>
      %103 = vector.broadcast %102 : vector<8x1xf32> to vector<8x32xf32>
      %104 = arith.mulf %94, %103 : vector<8x32xf32>
      %105 = vector.broadcast %87 : vector<1x32xf32> to vector<8x32xf32>
      %106 = arith.mulf %104, %105 : vector<8x32xf32>
      %107 = vector.broadcast %88 : vector<1x32xf32> to vector<8x32xf32>
      %108 = arith.addf %106, %107 : vector<8x32xf32>
      scf.yield %108 : vector<8x32xf32>
    }
    %c0_2 = arith.constant 0 : index
    %c0_3 = arith.constant 0 : index
    %c0_4 = arith.constant 0 : index
    %4 = vector.load %arg18[%c0_2, %c0_3, %c0_4] : memref<1x8x32xf32, #tpu.memory_space<vmem>>, vector<1x8x32xf32>
    %5 = vector.shape_cast %4 : vector<1x8x32xf32> to vector<8x32xf32>
    %6 = vector.shape_cast %3 : vector<8x32xf32> to vector<1x8x32xf32>
    tpu.vector_store %arg18[%c0_2, %c0_3, %c0_4], %6 {strides = array<i32>} : memref<1x8x32xf32, #tpu.memory_space<vmem>>, vector<1x8x32xf32>,
    return
  }
  func.func @transform_0(%arg0: i32) -> (i32, i32, i32) {
    %c0_i32 = arith.constant 0 : i32
    %c0_i32_0 = arith.constant 0 : i32
    %c0_i32_1 = arith.constant 0 : i32
    return %arg0, %c0_i32, %c0_i32_0 : i32, i32, i32
  }
  func.func @transform_1(%arg0: i32) -> (i32, i32) {
    %c0_i32 = arith.constant 0 : i32
    %c0_i32_0 = arith.constant 0 : i32
    %c0_i32_1 = arith.constant 0 : i32
    return %c0_i32, %c0_i32_0 : i32, i32
  }
  func.func @transform_2(%arg0: i32) -> (i32, i32) {
    %c0_i32 = arith.constant 0 : i32
    %c0_i32_0 = arith.constant 0 : i32
    %c0_i32_1 = arith.constant 0 : i32
    return %c0_i32, %c0_i32_0 : i32, i32
  }
  func.func @transform_3(%arg0: i32) -> (i32, i32) {
    %c0_i32 = arith.constant 0 : i32
    %c0_i32_0 = arith.constant 0 : i32
    %c0_i32_1 = arith.constant 0 : i32
    return %c0_i32, %c0_i32_0 : i32, i32
  }
  func.func @transform_4(%arg0: i32) -> (i32, i32) {
    %c0_i32 = arith.constant 0 : i32
    %c0_i32_0 = arith.constant 0 : i32
    %c0_i32_1 = arith.constant 0 : i32
    return %c0_i32, %c0_i32_0 : i32, i32
  }
  func.func @transform_5(%arg0: i32) -> (i32, i32) {
    %c0_i32 = arith.constant 0 : i32
    %c0_i32_0 = arith.constant 0 : i32
    %c0_i32_1 = arith.constant 0 : i32
    return %c0_i32, %c0_i32_0 : i32, i32
  }
  func.func @transform_6(%arg0: i32) -> (i32, i32) {
    %c0_i32 = arith.constant 0 : i32
    %c0_i32_0 = arith.constant 0 : i32
    %c0_i32_1 = arith.constant 0 : i32
    return %c0_i32, %c0_i32_0 : i32, i32
  }
  func.func @transform_7(%arg0: i32) -> (i32, i32) {
    %c0_i32 = arith.constant 0 : i32
    %c0_i32_0 = arith.constant 0 : i32
    %c0_i32_1 = arith.constant 0 : i32
    return %c0_i32, %c0_i32_0 : i32, i32
  }
  func.func @transform_8(%arg0: i32) -> (i32, i32) {
    %c0_i32 = arith.constant 0 : i32
    %c0_i32_0 = arith.constant 0 : i32
    %c0_i32_1 = arith.constant 0 : i32
    return %c0_i32, %c0_i32_0 : i32, i32
  }
  func.func @transform_9(%arg0: i32) -> (i32, i32) {
    %c0_i32 = arith.constant 0 : i32
    %c0_i32_0 = arith.constant 0 : i32
    %c0_i32_1 = arith.constant 0 : i32
    return %c0_i32, %c0_i32_0 : i32, i32
  }
  func.func @transform_10(%arg0: i32) -> (i32, i32) {
    %c0_i32 = arith.constant 0 : i32
    %c0_i32_0 = arith.constant 0 : i32
    %c0_i32_1 = arith.constant 0 : i32
    return %c0_i32, %c0_i32_0 : i32, i32
  }
  func.func @transform_11(%arg0: i32) -> (i32, i32) {
    %c0_i32 = arith.constant 0 : i32
    %c0_i32_0 = arith.constant 0 : i32
    %c0_i32_1 = arith.constant 0 : i32
    return %c0_i32, %c0_i32_0 : i32, i32
  }
  func.func @transform_12(%arg0: i32) -> (i32, i32) {
    %c0_i32 = arith.constant 0 : i32
    %c0_i32_0 = arith.constant 0 : i32
    %c0_i32_1 = arith.constant 0 : i32
    return %c0_i32, %c0_i32_0 : i32, i32
  }
  func.func @transform_13(%arg0: i32) -> (i32, i32) {
    %c0_i32 = arith.constant 0 : i32
    %c0_i32_0 = arith.constant 0 : i32
    %c0_i32_1 = arith.constant 0 : i32
    return %c0_i32, %c0_i32_0 : i32, i32
  }
  func.func @transform_14(%arg0: i32) -> (i32, i32) {
    %c0_i32 = arith.constant 0 : i32
    %c0_i32_0 = arith.constant 0 : i32
    %c0_i32_1 = arith.constant 0 : i32
    return %c0_i32, %c0_i32_0 : i32, i32
  }
  func.func @transform_15(%arg0: i32) -> (i32, i32) {
    %c0_i32 = arith.constant 0 : i32
    %c0_i32_0 = arith.constant 0 : i32
    %c0_i32_1 = arith.constant 0 : i32
    return %c0_i32, %c0_i32_0 : i32, i32
  }
  func.func @transform_16(%arg0: i32) -> (i32, i32) {
    %c0_i32 = arith.constant 0 : i32
    %c0_i32_0 = arith.constant 0 : i32
    %c0_i32_1 = arith.constant 0 : i32
    return %c0_i32, %c0_i32_0 : i32, i32
  }
  func.func @transform_17(%arg0: i32) -> (i32, i32, i32) {
    %c0_i32 = arith.constant 0 : i32
    %c0_i32_0 = arith.constant 0 : i32
    %c0_i32_1 = arith.constant 0 : i32
    return %arg0, %c0_i32, %c0_i32_0 : i32, i32, i32
  }
}

</mosaic_0001>

<bundles_post_ra>
// kernel: tpu_custom_call.1
= control target key start
LH: loop header
LB: loop body
LE: loop exit
PB: predicated region body
PF: predicated region fallthrough
CT: control target
= control target key end

     0   :  { %s2950_s0 = inlined_call_operand.vmem [shape: f32[2,8,32], index: 0, kind: input, shape index: {}]   ;;  %s2951_s1 = inlined_call_operand.vmem [shape: bf16[32,32], index: 1, kind: input, shape index: {}]   ;;  %s2952_s2 = inlined_call_operand.vmem [shape: f32[1,32], index: 2, kind: input, shape index: {}]   ;;  %s2953_s3 = inlined_call_operand.vmem [shape: bf16[32,32], index: 3, kind: input, shape index: {}]   ;;  %s2954_s4 = inlined_call_operand.vmem [shape: f32[1,32], index: 4, kind: input, shape index: {}]   ;;  %s2955_s5 = inlined_call_operand.hbm [shape: bf16[32,32], index: 5, kind: input, shape index: {}]   ;;  %s2956_s6 = inlined_call_operand.vmem [shape: f32[1,32], index: 6, kind: input, shape index: {}]   ;;  %s2957_s7 = inlined_call_operand.hbm [shape: bf16[32,32], index: 7, kind: input, shape index: {}]   ;;  %s2958_s8 = inlined_call_operand.vmem [shape: f32[1,32], index: 8, kind: input, shape index: {}]   ;;  %s2959_s9 = inlined_call_operand.vmem [shape: f32[1,32], index: 9, kind: input, shape index: {}]   ;;  %s2960_s10 = inlined_call_operand.vmem [shape: f32[1,32], index: 10, kind: input, shape index: {}]   ;;  %s2961_s11 = inlined_call_operand.hbm [shape: bf16[32,64], index: 11, kind: input, shape index: {}]   ;;  %s2962_s12 = inlined_call_operand.vmem [shape: f32[1,64], index: 12, kind: input, shape index: {}]   ;;  %s2963_s13 = inlined_call_operand.vmem [shape: bf16[64,32], index: 13, kind: input, shape index: {}]   ;;  %s2964_s14 = inlined_call_operand.vmem [shape: f32[1,32], index: 14, kind: input, shape index: {}]   ;;  %s2965_s15 = inlined_call_operand.vmem [shape: f32[1,32], index: 15, kind: input, shape index: {}]   ;;  %s2966_s16 = inlined_call_operand.vmem [shape: f32[1,32], index: 16, kind: input, shape index: {}]   ;;  %s2967_s17 = inlined_call_operand.hbm [shape: f32[2,8,32], index: 17, kind: output, shape index: {}]  }
   0x1   :  { %2977 = sst [smem:[#allocation18_spill]] %s2950_s0 }
   0x2   :  { %2978 = sst [smem:[#allocation19_spill]] %s2951_s1 }
   0x3   :  { %2979 = sst [smem:[#allocation20_spill]] %s2952_s2 }
   0x4   :  { %2980 = sst [smem:[#allocation21_spill]] %s2953_s3 }
   0x5   :  { %22 = vsyncpa [#allocation3], 0 }
   0x6   :  { %23 = vsyncpa [#allocation6], 0 }
   0x7   :  { %24 = vsyncpa [#allocation4], 0 }
   0x8   :  { %26 = vsyncpa [#allocation4 + $0x1], 0  ;;  %s2637_s24 = smov 0   ;;  %s2639_s25 = smov 0  }
   0x9   :  { %s2641_s26 = smov 0   ;;  %s2643_s27 = smov 0  }
   0xa LB: > { %2981 = sst [smem:[#allocation12_spill]] %s2509_s24  ;;  %s2658_s28 = sadd.s32 4294967295, %s2521_s27   ;;  %s2521_s27 = sphi %s2643_s27, %s3005_s27   ;;  %s2517_s26 = sphi %s2641_s26, %s3007_s26   ;;  %s2513_s25 = sphi %s2639_s25, %s3009_s25   ;;  %s2509_s24 = sphi %s2637_s24, %s3008_s24  }
   0xb   : > { %2982 = sst [smem:[#allocation13_spill]] %s2517_s26  ;;  %s2042_s29 = sadd.s32 4294967294, %s2521_s27  }
   0xc   : > { %2983 = sst [smem:[#allocation14_spill]] %s2521_s27  ;;  %s2662_s0 = sadd.s32 1, %s2521_s27  }
   0xd   : > { %2984 = sst [smem:[#allocation15_spill]] %s2662_s0  ;;  %s401_s30 = sadd.s32 1, %s2517_s26 }
   0xe   : > { %s398_s18 = ssub.s32 %s2521_s27, %s2662_s0  ;;  %p411_p0 = scmp.ne.s32.totalorder %s2517_s26, %s2513_s25 }
   0xf   : > { %p399_p1 = scmp.eq.s32.totalorder %s398_s18, 0  ;;  %p412_p2 = scmp.eq.s32.totalorder %s2658_s28, 1 }
  0x10   : > { %p417_p3 = scmp.ne.s32.totalorder %s2513_s25, %s2509_s24  ;;  %p418_p4 = scmp.eq.s32.totalorder %s2042_s29, 1 }
  0x11   : > { %s2673_s19 = scalar_select %p399_p1, %s2517_s26, %s401_s30  }
  0x12   : > { %p2675_p5 = por %p412_p2, %p411_p0  ;;  %p2679_p6 = por %p418_p4, %p417_p3 }
  0x13   : > { %2985 = sst [smem:[#allocation16_spill]] %s2673_s19  ;;  %p2043_p7 = scmp.ge.s32.totalorder %s2521_s27, 1 }
  0x14   : > { %s2986_s1 = scalar_select %p2675_p5, 1, 0 }
  0x15   : > { %s2987_s20 = scalar_select %p2679_p6, 1, 0 }
  0x16   : > { %p425_p8 = scmp.lt.s32.totalorder %s2521_s27, 3  ;;  %p2974_p9 = scmp.eq.s32.totalorder %s2658_s28, 0 }
  0x17   : > { %2988 = sst [smem:[#allocation17_spill]] %s2987_s20  ;;  %s2531_s22 = smov [#allocation5]  }
  0x18   : > { %p2686_p10 = pnand %p2043_p7, %p425_p8  ;;  %s465_s23 = sshll.u32 %s2531_s22, 4  ;;  %s466_s23 = int_to_ptr.vmem [resolvable:$true] %s465_s23 }
  0x19   : > { %s2532_s30 = smov [#allocation2]   ;;  %s2533_s19 = smov [#allocation7]  }
  0x1a   : > { %p2248_p11 = pneg %p2686_p10  ;;  %s449_s18 = sshll.u32 %s2532_s30, 4  ;;  %s450_s18 = int_to_ptr.vmem [resolvable:$true] %s449_s18 }
  0x1b   : > { %s487_s26 = sshll.u32 %s2533_s19, 4  ;;  %s2378_s0 = scalar_lea.vmem %s466_s23, 256  ;;  %s488_s26 = int_to_ptr.vmem [resolvable:$true] %s487_s26 }
  0x1c   : > { %p2694_p12 = pnand %p2974_p9, %p2248_p11  ;;  %p2379_p0 = scmp.ne.s32.totalorder %s466_s23, %s2378_s0 }
  0x1d   : > { %p2386_p3 = scmp.lt.s32.totalorder %s466_s23, %s466_s23  ;;  %p2387_p4 = scmp.lt.s32.totalorder %s2378_s0, %s2378_s0 }
  0x1e   : > { %p2369_p13 = pneg %p2694_p12 }
  0x1f   : > { %p2388_p7 = por %p2387_p4, %p2386_p3 }
  0x20   : > { %p2381_p1 = pnand %p2379_p0, %p2369_p13 }
  0x22   : > { %p2382_p2 = pneg %p2381_p1 }
  0x24   : > { %p2389_p8 = pnand %p2388_p7, %p2382_p2 }
  0x26   : > { %2392 = shalt.err (!%p2389_p8)
}
  0x27   : > { %s2534_s22 = smov 64   ;;  %s2535_s30 = smov 4  }
  0x28   : > { %2254 = dma.hbm_to_vmem [thread:$0]  (!%p2694_p12), %s2957_s7, 256, %s466_s23, [#allocation6], %s2534_s22, %s2534_s22, %s2535_s30  }
  0x29   : > { %s2404_s24 = scalar_lea.vmem %s450_s18, 256  ;;  %p2412_p9 = scmp.lt.s32.totalorder %s450_s18, %s450_s18 }
  0x2a   : > { %p2405_p11 = scmp.ne.s32.totalorder %s450_s18, %s2404_s24  ;;  %p2413_p6 = scmp.lt.s32.totalorder %s2404_s24, %s2404_s24 }
  0x2c   : > { %p2407_p0 = pnand %p2405_p11, %p2369_p13  ;;  %p2414_p3 = por %p2413_p6, %p2412_p9 }
  0x2e   : > { %p2408_p1 = pneg %p2407_p0 }
  0x30   : > { %p2415_p2 = pnand %p2414_p3, %p2408_p1 }
  0x32   : > { %2418 = shalt.err (!%p2415_p2)
}
  0x33   : > { %2251 = dma.hbm_to_vmem [thread:$0]  (!%p2694_p12), %s2955_s5, 256, %s450_s18, [#allocation3], %s2534_s22, %s2534_s22, %s2535_s30  }
  0x34   : > { %s2430_s20 = scalar_lea.vmem %s488_s26, 256  ;;  %p2438_p11 = scmp.lt.s32.totalorder %s488_s26, %s488_s26 }
  0x35   : > { %p2431_p4 = scmp.ne.s32.totalorder %s488_s26, %s2430_s20  ;;  %p2439_p0 = scmp.lt.s32.totalorder %s2430_s20, %s2430_s20 }
  0x37   : > { %p2433_p7 = pnand %p2431_p4, %p2369_p13  ;;  %p2440_p5 = por %p2439_p0, %p2438_p11 }
  0x39   : > { %p2434_p8 = pneg %p2433_p7 }
  0x3b   : > { %p2441_p6 = pnand %p2440_p5, %p2434_p8 }
  0x3d   : > { %2444 = shalt.err (!%p2441_p6)
}
  0x3e   : > { %2257 = dma.hbm_to_vmem [thread:$0]  (!%p2694_p12), %s2961_s11, 256, %s488_s26, [#allocation6], %s2534_s22, %s2534_s22, %s2535_s30  }
  0x3f   : > { %525 = sbr.rel (%p2686_p10) target bundleno = 2796 (0xaec), region = 88  ;;  %p2991_p9 = scmp.eq.s32.totalorder (!%p2686_p10), %s2658_s28, 0 }
  0x44   : > { %2496 = dma.done.wait (%p2991_p9), [#allocation3], 256   ;;  %p2992_p13 = pmov %p2991_p9 }
  0x45   : > { %p2993_p1 = pmov %p2991_p9 }
  0x46   : > { %2498 = vsyncadd (%p2992_p13), [#allocation3], 4294967040 }
  0x47   : > { %2500 = dma.done.wait (%p2993_p1), [#allocation6], 512   ;;  %p2994_p5 = pmov %p2993_p1 }
  0x48   : > { %p584_p12 = scmp.lt.s32.totalorder %s2658_s28, 1  ;;  %s581_s26 = sand.u32 1, %s2513_s25  }
  0x49   : > { %2502 = vsyncadd (%p2994_p5), [#allocation6], 4294966784  ;;  %s2738_s27 = sshll.u32 %s581_s26, 3  ;;  %s2995_s30 = sld [smem:[#allocation18_spill]] }
  0x4a   : > { %s585_s21 = scalar_select %p584_p12, %s2658_s28, 1 }
  0x4b   : > { %s583_s0 = scalar_lea.vmem [#allocation8], %s2738_s27  ;;  %s2747_s20 = smov 0  }
  0x4c   : > { %s2053_s29 = sshll.u32 %s585_s21, 3 }
  0x4f   : > { %s587_s19 = scalar_lea.vmem %s2995_s30, %s2053_s29 }
  0x50   : > { %v589_v0 = vld [vmem:[%s587_s19] sm:$0xff]  }
  0x51 LB: >> { %s2996_s3 = sld [smem:[#allocation21_spill]]  ;;  %v2536_v2 = vmov 0.0   ;;  %vm2537_vm0 = vmmov 0   ;;  %vm621_vm1 = vcmask 261120   ;;  %v597_v6 = vpack.c.bf16 %v2525_v0, %v2525_v0  ;;  %v2058_v7 = vld [vmem:[%s2954_s4] ss:$0 sm:$0xff]  ;;  %s2529_s20 = sphi %s2747_s20, %s595_s20   ;;  %v2525_v0 = vphi %v589_v0, %v2999_v0  }
  0x52   : >> { %2142 = vmatprep.subr.bf16.mxu1 %v2536_v2  ;;  %2134 = vmatprep.subr.bf16.mxu0 %v2536_v2  ;;  %s2997_s30 = sld [smem:[#allocation19_spill]]  ;;  %s2538_s22 = smov 104   ;;  %v2337_v21 = vld [vmem:[#allocation2 + $0x8] sm:$0xff]   ;;  %v2338_v22 = vld [vmem:[#allocation2] sm:$0xff]   ;;  %vm889_vm2 = vcmask 1043456   ;;  %vm885_vm3 = vcmask 64512  }
  0x53   : >> { %2146 = vmatprep.mubr.msk.bf16.mxu1 %vm2537_vm0, %v2536_v2  ;;  %2138 = vmatprep.mubr.msk.bf16.mxu0 %vm2537_vm0, %v2536_v2  ;;  %s2998_s2 = sld [smem:[#allocation20_spill]]  ;;  %s2539_s19 = smov 120   ;;  %v2062_v60 = vld [vmem:[%s2956_s6] ss:$0 sm:$0xff]  ;;  %vm1644_vm4 = vcmask 130048   ;;  %vm1646_vm5 = vcmask 195584  }
  0x54   : >> { %s2540_s24 = smov 112   ;;  %s2543_s29 = smov 16   ;;  %vm1854_vm6 = vcmask 523264  }
  0x55   : >> { %s2544_s18 = smov 8   ;;  %s595_s20 = sadd.s32 1, %s2529_s20  }
  0x56   : >> { %p592_p10 = scmp.ge.s32.totalorder %s595_s20, 2  }
  0x57   : >> { %v2333_v1 = vld [vmem:[%s2996_s3 + $0x8] sm:$0xff]   ;;  %v2334_v3 = vld [vmem:[%s2996_s3] sm:$0xff]   ;;  %p3000_p2 = scmp.ne.s32.totalorder (%p592_p10), %s2986_s1, 0 }
  0x58   : >> { %2143 = vmatpush3.bf16.msra.mxu1 %v2333_v1  ;;  %v2335_v4 = vld [vmem:[%s2997_s30 + $0x8] sm:$0xff]   ;;  %v2336_v5 = vld [vmem:[%s2997_s30] sm:$0xff]  }
  0x59   : >> { %2144 = vmatprep.subr.bf16.mxu1 %v2536_v2  ;;  %2135 = vmatpush3.bf16.msra.mxu0 %v2335_v4  ;;  %v2054_v9 = vld [vmem:[%s2998_s2] ss:$0 sm:$0xff] }
  0x5a   : >> { %2136 = vmatprep.subr.bf16.mxu0 %v2536_v2 }
  0x5c   : >> { %2145 = vmatpush3.bf16.msra.mxu1 %v2334_v3 }
  0x5d   : >> { %2158 = vmatprep.subr.bf16.mxu1 %v2536_v2  ;;  %2137 = vmatpush3.bf16.msra.mxu0 %v2336_v5 }
  0x5e   : >> { %2150 = vmatprep.subr.bf16.mxu0 %v2536_v2 }
  0x5f   : >> { %2147 = vmatmul.mubr.msk.bf16.vlgmr.msra.gmra.mxu1 %vm621_vm1, %v597_v6 }
  0x60   : >> { %2160 = vmatprep.mubr.msk.bf16.mxu1 %vm2537_vm0, %v2536_v2  ;;  %2139 = vmatmul.mubr.msk.bf16.vlgmr.msra.gmra.mxu0 %vm621_vm1, %v597_v6 }
  0x61   : >> { %2154 = vmatprep.mubr.msk.bf16.mxu0 %vm2537_vm0, %v2536_v2  ;;  %2151 = vmatpush3.bf16.msra.mxu0 %v2337_v21 }
  0x62   : >> { %2152 = vmatprep.subr.bf16.mxu0 %v2536_v2 }
  0x65   : >> { %2153 = vmatpush3.bf16.msra.mxu0 %v2338_v22 }
  0x66   : >> { %2164 = vmatprep.subr.bf16.mxu0 %v2536_v2 }
  0x68   : >> { %2155 = vmatmul.mubr.msk.bf16.vlgmr.msra.gmra.mxu0 %vm621_vm1, %v597_v6 }
  0x69   : >> { %2166 = vmatprep.mubr.msk.bf16.mxu0 %vm2537_vm0, %v2536_v2 }
 0x11f   : >> { %v722_v8 = vpop.f32.mrf.mxu1 }
 0x120   : >> { %v723_v10 = vadd.f32 %v2058_v7, %v722_v8  ;;  %v659_v12 = vpop.f32.mrf.mxu0 }
 0x121   : >> { %v2148_v11 = vpop.f32.mrf.mxu1  ;;  %v660_v14 = vadd.f32 %v2054_v9, %v659_v12 }
 0x122   : >> { %v799_v13 = vpack.c.bf16 %v723_v10, %v723_v10  ;;  %v2140_v16 = vpop.f32.mrf.mxu0 }
 0x123   : >> { %v725_v15 = vpop.f32.mrf.mxu1  ;;  %v791_v19 = vpack.c.bf16 %v660_v14, %v660_v14 }
 0x124   : >> { %807 = vrot.lane.b32.xlu1 %v799_v13, %s2538_s22  ;;  %801 = vrot.lane.b32.xlu0 %v799_v13, %s2539_s19  ;;  %v662_v18 = vpop.f32.mrf.mxu0 }
 0x125   : >> { %v2149_v17 = vpop.f32.mrf.mxu1 }
 0x126   : >> { %v2141_v20 = vpop.f32.mrf.mxu0 }
 0x128   : >> { %804 = vrot.lane.b32.xlu0 %v799_v13, %s2540_s24  ;;  %793 = vrot.lane.b32.xlu1 %v791_v19, %s2539_s19  ;;  %v785_v33 = vpop.f32.mrf.mxu0 }
 0x129   : >> { %v786_v62 = vadd.f32 %v2062_v60, %v785_v33 }
 0x12a   : >> { %v2156_v34 = vpop.f32.mrf.mxu0 }
 0x12b   : >> { %v810_v63 = vpack.c.bf16 %v786_v62, %v786_v62 }
 0x12c   : >> { %795 = vrot.lane.b32.xlu0 %v791_v19, %s2540_s24  ;;  %797 = vrot.lane.b32.xlu1 %v791_v19, %s2538_s22  ;;  %v788_v37 = vpop.f32.mrf.mxu0 }
 0x12e   : >> { %v2157_v38 = vpop.f32.mrf.mxu0 }
 0x14a   : >> { %821 = vxpose.xlu0.c.b16.start.end [1/1] (short) (narrow) %v799_v13, 16 }
 0x196   : >> { %v802_v23 = vpop.permute.xlu0 %801  ;;  %v808_v25 = vpop.permute.xlu1 %807 }
 0x197   : >> { %837 = vxpose.xlu1.c.b16.start.end [1/1] (short) (narrow) %v802_v23, 16 }
 0x19a   : >> { %v805_v24 = vpop.permute.xlu0 %804  ;;  %v794_v29 = vpop.permute.xlu1 %793 }
 0x19b   : >> { %853 = vxpose.xlu0.c.b16.start.end [1/1] (short) (narrow) %v805_v24, 16 }
 0x19e   : >> { %v796_v26 = vpop.permute.xlu0 %795  ;;  %v798_v30 = vpop.permute.xlu1 %797 }
 0x19f   : >> { %869 = vxpose.xlu0.c.b16.start.end [1/1] (short) (narrow) %v808_v25, 16 }
 0x1ac   : >> { %v829_v27 = vpop.trf.xlu0 }
 0x1ad   : >> { %v891_v28 = vsel %vm889_vm2, %v829_v27, 0 }
 0x1ae   : >> { %2159 = vmatpush3.bf16.msra.mxu1 %v891_v28 }
 0x1af   : >> { %2170 = vmatprep.subr.bf16.mxu1 %v2536_v2 }
 0x1b1   : >> { %2161 = vmatmul.mubr.msk.bf16.vlgmr.msra.gmra.mxu1 %vm885_vm3, %v791_v19 }
 0x1b2   : >> { %2172 = vmatprep.mubr.msk.bf16.mxu1 %vm2537_vm0, %v2536_v2 }
 0x1f9   : >> { %v845_v31 = vpop.trf.xlu1 }
 0x1fa   : >> { %v937_v32 = vsel %vm889_vm2, %v845_v31, 0 }
 0x1fb   : >> { %2165 = vmatpush3.bf16.msra.mxu0 %v937_v32 }
 0x1fc   : >> { %2176 = vmatprep.subr.bf16.mxu0 %v2536_v2 }
 0x1fd   : >> { %v861_v35 = vpop.trf.xlu0 }
 0x1fe   : >> { %v983_v36 = vsel %vm889_vm2, %v861_v35, 0  ;;  %2167 = vmatmul.mubr.msk.bf16.vlgmr.msra.gmra.mxu0 %vm885_vm3, %v794_v29 }
 0x1ff   : >> { %2171 = vmatpush3.bf16.msra.mxu1 %v983_v36  ;;  %2178 = vmatprep.mubr.msk.bf16.mxu0 %vm2537_vm0, %v2536_v2 }
 0x200   : >> { %2182 = vmatprep.subr.bf16.mxu1 %v2536_v2 }
 0x201   : >> { %v877_v39 = vpop.trf.xlu0 }
 0x202   : >> { %v1029_v40 = vsel %vm889_vm2, %v877_v39, 0  ;;  %2173 = vmatmul.mubr.msk.bf16.vlgmr.msra.gmra.mxu1 %vm885_vm3, %v796_v26 }
 0x203   : >> { %2177 = vmatpush3.bf16.msra.mxu0 %v1029_v40  ;;  %2184 = vmatprep.mubr.msk.bf16.mxu1 %vm2537_vm0, %v2536_v2 }
 0x204   : >> { %2188 = vmatprep.subr.bf16.mxu0 %v2536_v2 }
 0x206   : >> { %2179 = vmatmul.mubr.msk.bf16.vlgmr.msra.gmra.mxu0 %vm885_vm3, %v798_v30 }
 0x207   : >> { %2190 = vmatprep.mubr.msk.bf16.mxu0 %vm2537_vm0, %v2536_v2 }
 0x271   : >> { %v927_v41 = vpop.f32.mrf.mxu1 }
 0x272   : >> { %v1071_v42 = vsel %vm885_vm3, %v927_v41, -inf }
 0x273   : >> { %v2162_v43 = vpop.f32.mrf.mxu1  ;;  %1072 = vmax.xlane.f32.xlu1 %v1071_v42 }
 0x275   : >> { %v930_v44 = vpop.f32.mrf.mxu1 }
 0x277   : >> { %v2163_v45 = vpop.f32.mrf.mxu1 }
 0x2be   : >> { %v973_v46 = vpop.f32.mrf.mxu0 }
 0x2bf   : >> { %v1074_v47 = vsel %vm885_vm3, %v973_v46, -inf }
 0x2c0   : >> { %1075 = vmax.xlane.f32.xlu0 %v1074_v47  ;;  %v2168_v48 = vpop.f32.mrf.mxu0 }
 0x2c2   : >> { %v976_v49 = vpop.f32.mrf.mxu0  ;;  %v1019_v50 = vpop.f32.mrf.mxu1 }
 0x2c3   : >> { %v1077_v51 = vsel %vm885_vm3, %v1019_v50, -inf }
 0x2c4   : >> { %v2174_v52 = vpop.f32.mrf.mxu1  ;;  %1078 = vmax.xlane.f32.xlu1 %v1077_v51  ;;  %v2169_v53 = vpop.f32.mrf.mxu0 }
 0x2c6   : >> { %v1022_v54 = vpop.f32.mrf.mxu1  ;;  %v1065_v55 = vpop.f32.mrf.mxu0 }
 0x2c7   : >> { %v1080_v56 = vsel %vm885_vm3, %v1065_v55, -inf }
 0x2c8   : >> { %v2175_v57 = vpop.f32.mrf.mxu1  ;;  %1081 = vmax.xlane.f32.xlu0 %v1080_v56  ;;  %v2180_v58 = vpop.f32.mrf.mxu0 }
 0x2ca   : >> { %v1068_v59 = vpop.f32.mrf.mxu0 }
 0x2cc   : >> { %v2181_v61 = vpop.f32.mrf.mxu0 }
 0x2d5   : >> { %812 = vrot.lane.b32.xlu1 %v810_v63, %s2539_s19  ;;  %s2546_s19 = smov (%p592_p10), [#allocation8]  }
 0x2d6   : > { %s2449_s2 = sshll.u32 (%p592_p10), %s2546_s19, 4  ;;  %s2450_s2 = int_to_ptr.vmem [resolvable:$false] %s2449_s2 }
 0x2d7   : > { %s2451_s3 = scalar_lea.vmem (%p592_p10), %s2450_s2, 256 }
 0x2fc   : >> { %v1073_v1 = vpop.xlane.xlu1 %1072 }
 0x2fd   : >> { %v1083_v3 = vsub.f32 %v927_v41, %v1073_v1 }
 0x2ff   : >> { %v1087_v4 = vmul.f32 1.442695, %v1083_v3 }
 0x301   : >> { %2347 = vpow2.f32 %v1087_v4  ;;  %v2541_v4 = vmov 1983009808  }
 0x30e   : >> { %v2348_v5 = vpop.eup %2347 }
 0x30f   : >> { %v1095_v6 = vsel %vm885_vm3, %v2348_v5, 0.0 }
 0x310   : >> { %1096 = vadd.xlane.f32.xlu1 %v1095_v6  ;;  %v1500_v6 = vlaneseq }
 0x321   : >> { %818 = vrot.lane.b32.xlu1 %v810_v63, %s2538_s22  ;;  %s2545_s22 = smov 24  }
 0x344   : >> { %1119 = vxpose.xlu1.c.b16.start.end [1/1] (short) (narrow) %v810_v63, 16 }
 0x349   : >> { %v1076_v7 = vpop.xlane.xlu0 %1075 }
 0x34a   : >> { %v1084_v8 = vsub.f32 %v973_v46, %v1076_v7  ;;  %v2542_v7 = vmov 1934713408  }
 0x34c   : >> { %v1089_v9 = vmul.f32 1.442695, %v1084_v8  ;;  %v1530_v8 = vunpack.c.l.s4 %v2542_v7 }
 0x34d   : >> { %v1079_v10 = vpop.xlane.xlu1 %1078 }
 0x34e   : >> { %2349 = vpow2.f32 %v1089_v9  ;;  %v1085_v11 = vsub.f32 %v1019_v50, %v1079_v10  ;;  %v1501_v10 = vshrl.u32 %v1500_v6, 7 }
 0x350   : >> { %v1091_v12 = vmul.f32 1.442695, %v1085_v11 }
 0x351   : >> { %v1082_v13 = vpop.xlane.xlu0 %1081  ;;  %v813_v22 = vpop.permute.xlu1 %812 }
 0x352   : >> { %2351 = vpow2.f32 %v1091_v12  ;;  %v1086_v14 = vsub.f32 %v1065_v55, %v1082_v13  ;;  %v1531_v13 = vunpack.c.0.s8 %v1530_v8 }
 0x354   : >> { %v1093_v15 = vmul.f32 1.442695, %v1086_v14 }
 0x356   : >> { %2353 = vpow2.f32 %v1093_v15 }
 0x35b   : >> { %v2350_v16 = vpop.eup %2349 }
 0x35c   : >> { %v1098_v17 = vsel %vm885_vm3, %v2350_v16, 0.0 }
 0x35d   : >> { %1099 = vadd.xlane.f32.xlu0 %v1098_v17 }
 0x35f   : >> { %v2352_v18 = vpop.eup %2351 }
 0x360   : >> { %v1101_v19 = vsel %vm885_vm3, %v2352_v18, 0.0 }
 0x361   : >> { %1102 = vadd.xlane.f32.xlu0 %v1101_v19 }
 0x363   : >> { %v2354_v20 = vpop.eup %2353 }
 0x364   : >> { %v1104_v21 = vsel %vm885_vm3, %v2354_v20, 0.0 }
 0x365   : >> { %1105 = vadd.xlane.f32.xlu0 %v1104_v21 }
 0x37b   : >> { %815 = vrot.lane.b32.xlu0 %v810_v63, %s2540_s24  ;;  %s2095_s24 = sshll.u32 (%p592_p10), %s2658_s28, 7 }
 0x399   : >> { %v1097_v23 = vpop.xlane.xlu1 %1096  ;;  %1135 = vxpose.xlu0.c.b16.start.end [1/1] (short) (narrow) %v813_v22, 16 }
 0x39a   : >> { %2355 = vrcp.f32 %v1097_v23 }
 0x39d   : >> { %v819_v28 = vpop.permute.xlu1 %818 }
 0x3a6   : >> { %v1127_v29 = vpop.trf.xlu1 }
 0x3a7   : >> { %v2356_v24 = vpop.eup %2355 }
 0x3a8   : >> { %v1108_v25 = vmul.f32 %v2356_v24, %v2348_v5  ;;  %v1498_v5 = vunpack.c.l.s4 %v2541_v4 }
 0x3aa   : >> { %v1115_v26 = vpack.c.bf16 %v1108_v25, %v1108_v25  ;;  %v1499_v9 = vunpack.c.0.s8 %v1498_v5  ;;  %v2339_v25 = vld [vmem:[#allocation5 + $0x8] sm:$0xff]  }
 0x3ac   : >> { %v1187_v27 = vsel %vm885_vm3, %v1115_v26, 0  ;;  %v1502_v14 = vsub.s32 %v1499_v9, %v1501_v10 }
 0x3ad   : >> { %2183 = vmatpush3.bf16.xpose.msra.mxu1 %v1187_v27 }
 0x3ae   : >> { %2194 = vmatprep.subr.bf16.mxu1 %v2536_v2 }
 0x3b4   : >> { %2185 = vmatmul.mubr.msk.bf16.vlgmr.msra.gmra.mxu1 %vm885_vm3, %v1127_v29 }
 0x3b5   : >> { %2196 = vmatprep.mubr.msk.bf16.mxu1 %vm2537_vm0, %v2536_v2 }
 0x3e6   : >> { %v1100_v30 = vpop.xlane.xlu0 %1099 }
 0x3e7   : >> { %2357 = vrcp.f32 %v1100_v30 }
 0x3ea   : >> { %v1103_v31 = vpop.xlane.xlu0 %1102 }
 0x3eb   : >> { %2359 = vrcp.f32 %v1103_v31 }
 0x3ee   : >> { %v1106_v32 = vpop.xlane.xlu0 %1105 }
 0x3ef   : >> { %2361 = vrcp.f32 %v1106_v32 }
 0x3f2   : >> { %v816_v33 = vpop.permute.xlu0 %815 }
 0x3f3   : >> { %1151 = vxpose.xlu1.c.b16.start.end [1/1] (short) (narrow) %v816_v33, 16 }
 0x3f4   : >> { %v2358_v34 = vpop.eup %2357 }
 0x3f5   : >> { %v1110_v35 = vmul.f32 %v2358_v34, %v2350_v16  ;;  %v2340_v34 = vld [vmem:[#allocation5] sm:$0xff]  }
 0x3f7   : >> { %1167 = vxpose.xlu1.c.b16.start.end [1/1] (short) (narrow) %v819_v28, 16  ;;  %v1116_v36 = vpack.c.bf16 %v1110_v35, %v1110_v35 }
 0x3f8   : >> { %v2360_v37 = vpop.eup %2359 }
 0x3f9   : >> { %v1233_v38 = vsel %vm885_vm3, %v1116_v36, 0  ;;  %v1112_v39 = vmul.f32 %v2360_v37, %v2352_v18 }
 0x3fa   : >> { %2189 = vmatpush3.bf16.xpose.msra.mxu0 %v1233_v38 }
 0x3fb   : >> { %v1117_v40 = vpack.c.bf16 %v1112_v39, %v1112_v39  ;;  %2200 = vmatprep.subr.bf16.mxu0 %v2536_v2  ;;  %v1143_v44 = vpop.trf.xlu0 }
 0x3fc   : >> { %v2362_v41 = vpop.eup %2361 }
 0x3fd   : >> { %v1279_v42 = vsel %vm885_vm3, %v1117_v40, 0  ;;  %v1114_v43 = vmul.f32 %v2362_v41, %v2354_v20  ;;  %v1534_v20 = vsub.s32 %v1531_v13, %v1501_v10  ;;  %v2341_v13 = vld [vmem:[#allocation7 + $0x8] sm:$0xff]  }
 0x3fe   : >> { %2195 = vmatpush3.bf16.xpose.msra.mxu1 %v1279_v42 }
 0x3ff   : >> { %v1118_v45 = vpack.c.bf16 %v1114_v43, %v1114_v43  ;;  %2206 = vmatprep.subr.bf16.mxu1 %v2536_v2 }
 0x401   : >> { %2191 = vmatmul.mubr.msk.bf16.vlgmr.msra.gmra.mxu0 %vm885_vm3, %v1143_v44  ;;  %v1325_v46 = vsel %vm885_vm3, %v1118_v45, 0 }
 0x402   : >> { %2201 = vmatpush3.bf16.xpose.msra.mxu0 %v1325_v46  ;;  %2202 = vmatprep.mubr.msk.bf16.mxu0 %vm2537_vm0, %v2536_v2 }
 0x403   : >> { %2214 = vmatprep.subr.bf16.mxu0 %v2536_v2 }
 0x455   : >> { %v1159_v47 = vpop.trf.xlu1 }
 0x456   : >> { %2197 = vmatmul.mubr.msk.bf16.vlgmr.msra.gmra.mxu1 %vm885_vm3, %v1159_v47 }
 0x457   : >> { %2210 = vmatprep.mubr.msk.bf16.mxu1 %vm2537_vm0, %v2536_v2  ;;  %2207 = vmatpush3.bf16.msra.mxu1 %v2339_v25 }
 0x458   : >> { %2208 = vmatprep.subr.bf16.mxu1 %v2536_v2 }
 0x459   : >> { %v1175_v48 = vpop.trf.xlu1 }
 0x45a   : >> { %2203 = vmatmul.mubr.msk.bf16.vlgmr.msra.gmra.mxu0 %vm885_vm3, %v1175_v48 }
 0x45b   : >> { %2218 = vmatprep.mubr.msk.bf16.mxu0 %vm2537_vm0, %v2536_v2  ;;  %2209 = vmatpush3.bf16.msra.mxu1 %v2340_v34 }
 0x45c   : >> { %2222 = vmatprep.subr.bf16.mxu1 %v2536_v2  ;;  %2215 = vmatpush3.bf16.msra.mxu0 %v2341_v13 }
 0x45d   : >> { %2216 = vmatprep.subr.bf16.mxu0 %v2536_v2 }
 0x474   : >> { %v1223_v49 = vpop.f32.mrf.mxu1 }
 0x475   : >> { %1367 = vxpose.xlu0.b32.start.end [1/1] (short) (narrow) %v1223_v49, 8 }
 0x476   : >> { %v2186_v50 = vpop.f32.mrf.mxu1 }
 0x478   : >> { %v1226_v51 = vpop.f32.mrf.mxu1 }
 0x47a   : >> { %v2187_v52 = vpop.f32.mrf.mxu1 }
 0x4c1   : >> { %v1269_v53 = vpop.f32.mrf.mxu0 }
 0x4c2   : >> { %1399 = vxpose.xlu1.b32.start.end [1/1] (short) (narrow) %v1269_v53, 8 }
 0x4c3   : >> { %v2192_v54 = vpop.f32.mrf.mxu0 }
 0x4c5   : >> { %v1272_v55 = vpop.f32.mrf.mxu0 }
 0x4c7   : >> { %v2193_v56 = vpop.f32.mrf.mxu0 }
 0x4f1   : >> { %v1383_v3 = vpop.trf.xlu0 }
 0x516   : >> { %v1315_v57 = vpop.f32.mrf.mxu1 }
 0x517   : >> { %1431 = vxpose.xlu0.b32.start.end [1/1] (short) (narrow) %v1315_v57, 8 }
 0x518   : >> { %v2198_v58 = vpop.f32.mrf.mxu1 }
 0x51a   : >> { %v1318_v59 = vpop.f32.mrf.mxu1  ;;  %v1361_v60 = vpop.f32.mrf.mxu0 }
 0x51b   : >> { %1463 = vxpose.xlu0.b32.start.end [1/1] (short) (narrow) %v1361_v60, 8 }
 0x51c   : >> { %v2199_v61 = vpop.f32.mrf.mxu1  ;;  %v2204_v62 = vpop.f32.mrf.mxu0 }
 0x51d   : >> { %v2076_v62 = vld [vmem:[%s2958_s8] ss:$0 sm:$0xff] }
 0x51e   : >> { %v1364_v63 = vpop.f32.mrf.mxu0 }
 0x520   : >> { %v2205_v1 = vpop.f32.mrf.mxu0 }
 0x53e   : >> { %v1415_v12 = vpop.trf.xlu1 }
 0x593   : >> { %v1447_v11 = vpop.trf.xlu0 }
 0x594   : >> { %v1495_v15 = vcombine.low %v1383_v3, %v1447_v11  ;;  %v1496_v16 = vcombine.high %v1383_v3, %v1447_v11 }
 0x596   : >> { %v1503_v21 = vrot.slane %v1495_v15, %v1502_v14  ;;  %v1510_v22 = vrot.slane %v1496_v16, %v1502_v14  ;;  %v2344_v15 = vld [vmem:[%s2963_s13 + $0x10] sm:$0xff]  }
 0x597   : >> { %v1479_v17 = vpop.trf.xlu0 }
 0x598   : >> { %v1511_v18 = vcombine.low %v1415_v12, %v1479_v17  ;;  %v1512_v19 = vcombine.high %v1415_v12, %v1479_v17 }
 0x59a   : >> { %v1519_v23 = vrot.slane %v1511_v18, %v1502_v14  ;;  %v1526_v24 = vrot.slane %v1512_v19, %v1502_v14 }
 0x59c   : >> { %v1527_v26 = vcombine.low %v1503_v21, %v1519_v23  ;;  %v1528_v27 = vcombine.high %v1503_v21, %v1519_v23  ;;  %v1543_v28 = vcombine.low %v1510_v22, %v1526_v24  ;;  %v1544_v29 = vcombine.high %v1510_v22, %v1526_v24  ;;  %v2081_v22 = vld [vmem:[%s2960_s10] ss:$0 sm:$0xff] }
 0x59e   : >> { %v1535_v30 = vrot.slane %v1527_v26, %v1534_v20  ;;  %v1542_v31 = vrot.slane %v1528_v27, %v1534_v20  ;;  %v1551_v32 = vrot.slane %v1543_v28, %v1534_v20  ;;  %v1558_v33 = vrot.slane %v1544_v29, %v1534_v20  ;;  %v2345_v26 = vld [vmem:[%s2963_s13 + $0x8] sm:$0xff]   ;;  %v2346_v27 = vld [vmem:[%s2963_s13] sm:$0xff]  }
 0x59f   : >> { %v2082_v28 = vld [vmem:[%s2962_s12] ss:$0 sm:$0xff] }
 0x5a0   : >> { %v1563_v35 = vcombine.low %v1535_v30, %v1542_v31  ;;  %v2074_v36 = vcombine.high %v1535_v30, %v1542_v31  ;;  %v1579_v37 = vcombine.low %v1551_v32, %v1558_v33  ;;  %v2075_v38 = vcombine.high %v1551_v32, %v1558_v33 }
 0x5a2   : >> { %v1570_v39 = vrot.slane %v1563_v35, %v1502_v14  ;;  %v1578_v40 = vrot.slane %v2074_v36, %v1502_v14  ;;  %v1586_v41 = vrot.slane %v1579_v37, %v1502_v14  ;;  %v1594_v42 = vrot.slane %v2075_v38, %v1502_v14  ;;  %v2342_v14 = vld [vmem:[#allocation7] sm:$0xff]  }
 0x5a3   : >> { %2217 = vmatpush3.bf16.msra.mxu0 %v2342_v14 }
 0x5a4   : >> { %v1596_v43 = vcombine.high %v1570_v39, %v1578_v40  ;;  %v1612_v44 = vcombine.high %v1586_v41, %v1594_v42  ;;  %v1595_v45 = vcombine.low %v1570_v39, %v1578_v40  ;;  %v1611_v46 = vcombine.low %v1586_v41, %v1594_v42 }
 0x5a6   : >> { %v1610_v47 = vrot.slane %v1596_v43, %v1534_v20  ;;  %v1626_v48 = vrot.slane %v1612_v44, %v1534_v20  ;;  %v1603_v49 = vrot.slane %v1595_v45, %v1534_v20  ;;  %v1619_v50 = vrot.slane %v1611_v46, %v1534_v20  ;;  %v2080_v20 = vld [vmem:[%s2959_s9] ss:$0 sm:$0xff] }
 0x5a8   : >> { %v1629_v51 = vcombine.low %v1610_v47, %v1626_v48  ;;  %v1628_v52 = vcombine.high %v1603_v49, %v1619_v50  ;;  %v1627_v53 = vcombine.low %v1603_v49, %v1619_v50  ;;  %v1630_v54 = vcombine.high %v1610_v47, %v1626_v48 }
 0x5aa   : >> { %1636 = vrot.lane.b32.xlu0 %v1629_v51, %s2543_s29  ;;  %1632 = vrot.lane.b32.xlu1 %v1628_v52, %s2544_s18  ;;  %v2092_v52 = vld [vmem:[%s2965_s15] ss:$0 sm:$0xff]  ;;  %s1942_s29 = scalar_lea.hbm (%p592_p10), %s2967_s17, %s2095_s24  ;;  %s1944_s18 = sshll.u32 (%p592_p10), %s583_s0, 4  ;;  %s1945_s18 = int_to_ptr.vmem [resolvable:$true] %s1944_s18 }
 0x5ab   : > { %s2445_s20 = scalar_lea.vmem (%p592_p10), %s1945_s18, 128  ;;  %p2452_p8 = scmp.lt.s32.totalorder (%p592_p10), %s1945_s18, %s2450_s2 }
 0x5ac   : > { %p2446_p3 = scmp.ne.s32.totalorder (%p592_p10), %s1945_s18, %s2445_s20  ;;  %p2453_p11 = scmp.lt.s32.totalorder (%p592_p10), %s2451_s3, %s2445_s20 }
 0x5ae   : >> { %1640 = vrot.lane.b32.xlu1 %v1630_v54, %s2545_s22  ;;  %v2093_v54 = vld [vmem:[%s2966_s16] ss:$0 sm:$0xff]  ;;  %s1931_s22 = scalar_lea.sflag (%p592_p10), [#allocation4], %s581_s26  ;;  %p2447_p4 = pnand (%p592_p10), %p2446_p3, %p3000_p2 }
 0x5af   : > { %p2454_p0 = por (%p592_p10), %p2453_p11, %p2452_p8 }
 0x5b0   : > { %p2448_p7 = pneg (%p592_p10), %p2447_p4 }
 0x5b2   : > { %p2455_p6 = pnand (%p592_p10), %p2454_p0, %p2448_p7 }
 0x61c   : >> { %v1633_v55 = vpop.permute.xlu1 %1632  ;;  %v1637_v56 = vpop.permute.xlu0 %1636 }
 0x61d   : >> { %v1643_v57 = vsel %vm885_vm3, %v1627_v53, %v1633_v55 }
 0x61e   : >> { %v1645_v59 = vsel %vm1644_vm4, %v1643_v57, %v1637_v56 }
 0x620   : >> { %v1641_v58 = vpop.permute.xlu1 %1640 }
 0x621   : >> { %v1647_v60 = vsel %vm1646_vm5, %v1645_v59, %v1641_v58 }
 0x622   : >> { %v1648_v61 = vpack.c.bf16 %v1647_v60, %v1647_v60 }
 0x624   : >> { %2211 = vmatmul.mubr.msk.bf16.vlgmr.msra.gmra.mxu1 %vm621_vm1, %v1648_v61 }
 0x625   : >> { %2230 = vmatprep.mubr.msk.bf16.mxu1 %vm2537_vm0, %v2536_v2 }
 0x6e4   : >> { %v1709_v63 = vpop.f32.mrf.mxu1 }
 0x6e5   : >> { %v1710_v1 = vadd.f32 %v2076_v62, %v1709_v63 }
 0x6e6   : >> { %v2212_v3 = vpop.f32.mrf.mxu1 }
 0x6e7   : >> { %v1715_v4 = vadd.f32 %v2525_v0, %v1710_v1  ;;  %v2343_v0 = vld [vmem:[%s2963_s13 + $0x18] sm:$0xff]  }
 0x6e8   : >> { %v1712_v5 = vpop.f32.mrf.mxu1  ;;  %2223 = vmatpush3.bf16.msra.mxu1 %v2343_v0 }
 0x6e9   : >> { %v1718_v6 = vsel %vm621_vm1, %v1715_v4, 0.0  ;;  %2224 = vmatprep.subr.bf16.mxu1 %v2536_v2 }
 0x6ea   : >> { %1719 = vadd.xlane.f32.xlu1 %v1718_v6  ;;  %v2213_v7 = vpop.f32.mrf.mxu1 }
 0x6ec   : >> { %2225 = vmatpush3.bf16.msra.mxu1 %v2344_v15 }
 0x6ed   : >> { %2226 = vmatprep.subr.bf16.mxu1 %v2536_v2 }
 0x6f0   : >> { %2227 = vmatpush3.bf16.msra.mxu1 %v2345_v26 }
 0x6f1   : >> { %2228 = vmatprep.subr.bf16.mxu1 %v2536_v2  ;;  %v2086_v2 = vld [vmem:[%s2964_s14] ss:$0 sm:$0xff] }
 0x6f4   : >> { %2229 = vmatpush3.bf16.msra.mxu1 %v2346_v27 }
 0x773   : >> { %v1720_v8 = vpop.xlane.xlu1 %1719 }
 0x774   : >> { %v1722_v9 = vmul.f32 0.03125, %v1720_v8 }
 0x776   : >> { %v1723_v10 = vsub.f32 %v1715_v4, %v1722_v9 }
 0x778   : >> { %v1724_v11 = vmul.f32 %v1723_v10, %v1723_v10 }
 0x77a   : >> { %v1725_v12 = vsel %vm621_vm1, %v1724_v11, 0.0 }
 0x77b   : >> { %1726 = vadd.xlane.f32.xlu0 %v1725_v12 }
 0x804   : >> { %v1727_v16 = vpop.xlane.xlu0 %1726 }
 0x805   : >> { %v1728_v17 = vmul.f32 0.03125, %v1727_v16 }
 0x807   : >> { %v1729_v18 = vadd.f32 1e-05, %v1728_v17 }
 0x809   : >> { %2363 = vrsqrt.f32 %v1729_v18 }
 0x816   : >> { %v2364_v19 = vpop.eup %2363 }
 0x817   : >> { %v1731_v21 = vmul.f32 %v2364_v19, %v1723_v10 }
 0x819   : >> { %v1738_v23 = vmul.f32 %v2080_v20, %v1731_v21 }
 0x81b   : >> { %v1745_v24 = vadd.f32 %v2081_v22, %v1738_v23 }
 0x81d   : >> { %v1746_v25 = vpack.c.bf16 %v1745_v24, %v1745_v24 }
 0x81f   : >> { %2219 = vmatmul.mubr.msk.bf16.vlgmr.msra.gmra.mxu0 %vm621_vm1, %v1746_v25 }
 0x8df   : >> { %v1807_v29 = vpop.f32.mrf.mxu0 }
 0x8e0   : >> { %v1808_v30 = vadd.f32 %v2082_v28, %v1807_v29 }
 0x8e1   : >> { %v2220_v31 = vpop.f32.mrf.mxu0 }
 0x8e2   : >> { %v1813_v32 = vmax.f32 %v1808_v30, 0.0 }
 0x8e3   : >> { %v1810_v33 = vpop.f32.mrf.mxu0 }
 0x8e4   : >> { %v1814_v34 = vpack.c.bf16 %v1813_v32, %v1813_v32 }
 0x8e5   : >> { %v2221_v35 = vpop.f32.mrf.mxu0 }
 0x8e6   : >> { %2231 = vmatmul.mubr.msk.bf16.vlgmr.msra.gmra.mxu1 %vm1854_vm6, %v1814_v34 }
 0x9a6   : >> { %v1892_v36 = vpop.f32.mrf.mxu1 }
 0x9a7   : >> { %v1893_v37 = vadd.f32 %v2086_v2, %v1892_v36 }
 0x9a8   : >> { %v2232_v38 = vpop.f32.mrf.mxu1 }
 0x9a9   : >> { %v1898_v39 = vadd.f32 %v1893_v37, %v1745_v24 }
 0x9aa   : >> { %v1895_v40 = vpop.f32.mrf.mxu1 }
 0x9ab   : >> { %v1901_v41 = vsel %vm621_vm1, %v1898_v39, 0.0 }
 0x9ac   : >> { %1902 = vadd.xlane.f32.xlu1 %v1901_v41  ;;  %v2233_v42 = vpop.f32.mrf.mxu1 }
 0xa35   : >> { %v1903_v43 = vpop.xlane.xlu1 %1902 }
 0xa36   : >> { %v1904_v44 = vmul.f32 0.03125, %v1903_v43 }
 0xa38   : >> { %v1905_v45 = vsub.f32 %v1898_v39, %v1904_v44 }
 0xa3a   : >> { %v1906_v46 = vmul.f32 %v1905_v45, %v1905_v45 }
 0xa3c   : >> { %v1907_v47 = vsel %vm621_vm1, %v1906_v46, 0.0 }
 0xa3d   : >> { %1908 = vadd.xlane.f32.xlu0 %v1907_v47 }
 0xac6   : >> { %v1909_v48 = vpop.xlane.xlu0 %1908 }
 0xac7   : >> { %v1910_v49 = vmul.f32 0.03125, %v1909_v48 }
 0xac9   : >> { %v1911_v50 = vadd.f32 1e-05, %v1910_v49 }
 0xacb   : >> { %2365 = vrsqrt.f32 %v1911_v50 }
 0xad8   : >> { %v2366_v51 = vpop.eup %2365 }
 0xad9   : >> { %v1913_v53 = vmul.f32 %v2366_v51, %v1905_v45 }
 0xadb   : >> { %v1920_v55 = vmul.f32 %v2092_v52, %v1913_v53  ;;  %594 = sbr.rel (!%p592_p10) target bundleno = 81 (0x51), region = 143 }
 0xadd   : >> { %v1927_v56 = vadd.f32 %v2093_v54, %v1920_v55  }
 0xadf   : >> { %v2999_v0 = vmov %v1927_v56  ;;  %1929 = vst.msk [vmem:[%s583_s0] sm:$0xff] (%p592_p10), %vm621_vm1, %v1927_v56 }
 0xae0   : > { %2458 = shalt.err (!%p2455_p6)
}
 0xae1   : > { %s2459_s28 = scalar_lea.hbm %s1942_s29, 128  ;;  %s2463_s0 = scalar_lea.hbm %s2967_s17, 256 }
 0xae2   : > { %p2460_p9 = scmp.ne.s32.totalorder %s1942_s29, %s2459_s28  ;;  %p2464_p5 = scmp.lt.s32.totalorder %s1942_s29, %s2967_s17 }
 0xae3   : > { %p2465_p12 = scmp.lt.s32.totalorder %s2463_s0, %s2459_s28 }
 0xae4   : > { %p2461_p13 = pnand %p2460_p9, %p3000_p2 }
 0xae5   : > { %p2466_p10 = por %p2465_p12, %p2464_p5 }
 0xae6   : > { %p2462_p1 = pneg %p2461_p13 }
 0xae8   : > { %p2467_p3 = pnand %p2466_p10, %p2462_p1 }
 0xaea   : > { %2470 = shalt.err (!%p2467_p3)
}
 0xaeb   : > { %2246 = dma.vmem_to_hbm [thread:$0]  (%p3000_p2), %s1945_s18, 128, %s1942_s29, %s1931_s22  }
 0xaec PF: > { %s3001_s2 = sld [smem:[#allocation14_spill]] }
 0xaed   : > { %s3002_s3 = sld [smem:[#allocation12_spill]] }
 0xaee   : > { %s3003_s21 = sld [smem:[#allocation17_spill]] }
 0xaf2   : > { %p2268_p4 = scmp.ge.s32.totalorder %s3001_s2, 2 }
 0xaf3   : > { %s1956_s20 = sand.u32 1, %s3002_s3  }
 0xaf4   : > { %p3004_p7 = scmp.ne.s32.totalorder %s3003_s21, 0  ;;  %s1957_s19 = scalar_lea.sflag [#allocation4], %s1956_s20 }
 0xaf6   : > { %p2259_p8 = pnand %p2268_p4, %p3004_p7 }
 0xaf8   : > { %p2260_p11 = pneg %p2259_p8 }
 0xafa   : > { %2504 = dma.done.wait (%p2260_p11), %s1957_s19, 128  }
 0xafb   : > { %2506 = vsyncadd (%p2260_p11), %s1957_s19, 4294967168  ;;  %s3005_s27 = sld [smem:[#allocation15_spill]]  ;;  %s3008_s24 = smov %s2513_s25 }
 0xafc   : > { %s3006_s28 = sld [smem:[#allocation13_spill]] }
 0xafd   : > { %s3007_s26 = sld [smem:[#allocation16_spill]] }
 0xb01   : > { %p29_p0 = scmp.ge.s32.totalorder %s3005_s27, 4  }
 0xb02   : > { %s3009_s25 = smov %s3006_s28 }
 0xb03   :  { %31 = sbr.rel (!%p29_p0) target bundleno = 10 (0xa), region = 154 }
 0xb08   :  { %1962 = vsyncpa [#allocation3], 1 }
 0xb09   :  { %1964 = vsyncpa [#allocation3 + $0x1], 1 }
 0xb0a   :  { %1965 = vsyncpa [#allocation6], 1 }
 0xb0b   :  { %1966 = vsyncpa [#allocation4], 1 }
 0xb0c   :  { %1968 = vsyncpa [#allocation4 + $0x1], 1 }

</bundles_post_ra>
